<compile_context>
chip_gen: v6e
topology: v6e:2x2x1
jax: 0.10.0
libtpu: 0.0.40
codegen_flags: <defaults>
</compile_context>

<pallas_src>
import functools

import jax
import jax.numpy as jnp
from jax import lax
from jax.experimental import pallas as pl
from jax.experimental.pallas import tpu as pltpu

EPS = 1e-5  # torch.nn.InstanceNorm2d default


def _round_up(x, m):
    return (x + m - 1) // m * m


def _pick_cout_tile(cout):
    """Tile Cout only when it splits into >=2 bf16-friendly (multiple-of-16) tiles."""
    for t in (256, 128, 64, 32, 16):
        if cout % t == 0 and cout // t >= 2:
            return t
    return cout


def _make_kernel(k, Cin_p, stride, Wp, L_pad, inv_n):
    """Fused conv + instance-norm kernel. All sizes are Python ints (static)."""
    stacked_rows = stride > 1  # for stride>1 the wrapper pre-gathers k row-phases

    def kernel(x_ref, w_ref, m_ref, g_ref, b_ref, o_ref, stk_ref):
        # x_ref : (1, R, Cin_p, Lx)    bf16   (R = 1 for stride 1, k otherwise)
        # w_ref : (CT, k*k*Cin_p)      bf16
        # m_ref : (1, L_pad)           f32    (resident validity mask)
        # g_ref, b_ref : (CT, 1)       f32
        # o_ref : (1, CT, L_pad)       bf16
        # stk_ref: (k*k*Cin_p, L_pad)  bf16   VMEM scratch (stacked big-K operand)

        # --- stack the k*k shifted slices into the big-K operand (VMEM scratch) ---
        for ki in range(k):
            ri = ki if stacked_rows else 0
            row_off = 0 if stacked_rows else ki * Wp
            for kj in range(k):
                off = row_off + kj                     # static lane offset
                t = ki * k + kj
                stk_ref[t * Cin_p:(t + 1) * Cin_p, :] = \
                    x_ref[0, ri, :, off:off + L_pad]

        # --- one MXU matmul with K = k*k*Cin_p, f32 accumulation -----------------
        acc = jnp.dot(w_ref[...], stk_ref[...],
                      preferred_element_type=jnp.float32)        # (CT, L_pad) f32

        # --- per-channel instance-norm statistics over the valid positions -------
        vmask = m_ref[...]                                       # (1, L_pad) f32
        masked = acc * vmask
        mean = jnp.sum(masked, axis=1, keepdims=True) * inv_n    # (CT, 1)
        centered = (acc - mean) * vmask                          # shifted variance
        var = jnp.sum(centered * centered, axis=1, keepdims=True) * inv_n

        scale = g_ref[...] * lax.rsqrt(var + EPS)                # (CT, 1)
        shift = b_ref[...] - mean * scale
        o_ref[0] = (acc * scale + shift).astype(o_ref.dtype)     # lane-dense bf16 store

    return kernel


@functools.partial(jax.jit, static_argnames=("kernel_size", "stride"))
def conv_layer_forward(x, weight, bias, gamma, beta, *, kernel_size, stride):
    """x: (N, Cin, H, W) f32. weight: (Cout, Cin, k, k). Returns (N, Cout, Ho, Wo) bf16."""
    del bias  # exactly cancelled by the instance-norm mean subtraction (instance path)

    N, Cin, H, W = x.shape
    Cout = weight.shape[0]
    k = kernel_size
    pad = k // 2

    # Cast to bf16 BEFORE padding (halves the pad op's HBM traffic).
    xb = x.astype(jnp.bfloat16)
    x_pad = jnp.pad(xb, ((0, 0), (0, 0), (pad, pad), (pad, pad)), mode="reflect")
    Hp, Wp = H + 2 * pad, W + 2 * pad

    Ho = (Hp - k) // stride + 1
    Wo = (Wp - k) // stride + 1
    Wo_full = Wp - k + 1                       # stride-1 valid columns per row

    Cin_p = _round_up(Cin, 8)                  # sublane-aligned stacking
    L_real = Ho * Wp                           # flattened per-sample compute length
    L_pad = _round_up(L_real, 128)             # lane-dense stores

    if stride == 1:
        R = 1
        max_off = (k - 1) * Wp + (k - 1)
        x_flat = x_pad.reshape(N, 1, Cin, Hp * Wp)
        base_len = Hp * Wp
    else:
        # Pre-gather the k row-phases with stride (k-fold row copy only, no k^2 im2col):
        # compute is restricted to the Ho strided output rows.
        R = k
        max_off = k - 1
        rows_last = (Ho - 1) * stride + 1
        x_rows = jnp.stack(
            [x_pad[:, :, d:d + rows_last:stride, :] for d in range(k)], axis=1
        )                                                # (N, k, Cin, Ho, Wp)
        x_flat = x_rows.reshape(N, k, Cin, Ho * Wp)
        base_len = Ho * Wp

    Lx = _round_up(max_off + L_pad, 128)
    # Single combined pad: channels -> Cin_p, flattened tail -> Lx (zeros).
    x_flat = jnp.pad(x_flat, ((0, 0), (0, 0), (0, Cin_p - Cin), (0, Lx - base_len)))

    # Weights: (Cout, Cin, k, k) -> (Cout, k, k, Cin_p) -> (Cout, k*k*Cin_p), bf16.
    w_t = jnp.transpose(weight, (0, 2, 3, 1))
    w_t = jnp.pad(w_t, ((0, 0), (0, 0), (0, 0), (0, Cin_p - Cin)))
    Kc = k * k * Cin_p
    w2 = w_t.reshape(Cout, Kc).astype(jnp.bfloat16)

    g_col = gamma.reshape(Cout, 1).astype(jnp.float32)
    b_col = beta.reshape(Cout, 1).astype(jnp.float32)

    # Hoisted validity mask (computed once on host, resident input in VMEM).
    pos = jnp.arange(L_pad, dtype=jnp.int32)
    col = pos % Wp
    valid = (pos < L_real) & (col < Wo_full)
    if stride > 1:
        valid = valid & (col % stride == 0)
    mask = valid.astype(jnp.float32).reshape(1, L_pad)

    n_valid = Ho * Wo
    CT = _pick_cout_tile(Cout)
    n_ct = Cout // CT

    kernel = _make_kernel(k, Cin_p, stride, Wp, L_pad, 1.0 / float(n_valid))

    # VMEM budget estimate -> raise the scoped limit (v6e has 128 MiB physical).
    est = (2 * R * Cin_p * Lx * 2        # double-buffered input (bf16)
           + 2 * CT * L_pad * 2          # double-buffered output (bf16)
           + 2 * CT * Kc * 2             # weights (bf16)
           + 2 * L_pad * 4               # mask (f32)
           + Kc * L_pad * 2              # stacked big-K scratch (bf16)
           + 6 * CT * L_pad * 4)         # f32 acc / temporaries headroom
    vmem_limit = int(min(100 * 2 ** 20, max(32 * 2 ** 20, 2 * est)))

    out_flat = pl.pallas_call(
        kernel,
        out_shape=jax.ShapeDtypeStruct((N, Cout, L_pad), jnp.bfloat16),
        grid_spec=pltpu.PrefetchScalarGridSpec(
            num_scalar_prefetch=0,
            grid=(N, n_ct),
            in_specs=[
                pl.BlockSpec((1, R, Cin_p, Lx), lambda n, j: (n, 0, 0, 0)),  # input
                pl.BlockSpec((CT, Kc), lambda n, j: (j, 0)),                 # weights
                pl.BlockSpec((1, L_pad), lambda n, j: (0, 0)),               # mask (resident)
                pl.BlockSpec((CT, 1), lambda n, j: (j, 0)),                  # gamma
                pl.BlockSpec((CT, 1), lambda n, j: (j, 0)),                  # beta
            ],
            out_specs=pl.BlockSpec((1, CT, L_pad), lambda n, j: (n, j, 0)),
            scratch_shapes=[pltpu.VMEM((Kc, L_pad), jnp.bfloat16)],
        ),
        compiler_params=pltpu.CompilerParams(
            dimension_semantics=("parallel", "parallel"),
            vmem_limit_bytes=vmem_limit,
        ),
    )(x_flat, w2, mask, g_col, b_col)

    # (N, Cout, L_pad) -> (N, Cout, Ho, Wp) -> keep real (strided) conv columns.
    out = out_flat[:, :, :L_real].reshape(N, Cout, Ho, Wp)
    out = out[:, :, :, 0:Wo_full:stride]                         # (N, Cout, Ho, Wo)
    return out


def _reference(x, weight, bias, gamma, beta, kernel_size, stride):
    pad = kernel_size // 2
    x_pad = jnp.pad(x, ((0, 0), (0, 0), (pad, pad), (pad, pad)), mode="reflect")
    y = lax.conv_general_dilated(
        x_pad, weight, window_strides=(stride, stride), padding="VALID",
        dimension_numbers=("NCHW", "OIHW", "NCHW"),
    ) + bias.reshape(1, -1, 1, 1)
    mean = jnp.mean(y, axis=(2, 3), keepdims=True)
    var = jnp.mean((y - mean) ** 2, axis=(2, 3), keepdims=True)
    y = (y - mean) * lax.rsqrt(var + EPS)
    return y * gamma.reshape(1, -1, 1, 1) + beta.reshape(1, -1, 1, 1)


if __name__ == "__main__":
    # Small shapes consistent with the module.
    N, Cin, H, W = 2, 4, 16, 16
    Cout, k = 8, 3

    key = jax.random.PRNGKey(0)
    kx, kw, kb, kg, kbt = jax.random.split(key, 5)
    x = jax.random.normal(kx, (N, Cin, H, W), dtype=jnp.float32)
    weight = jax.random.normal(kw, (Cout, Cin, k, k), dtype=jnp.float32) * 0.1
    bias = jax.random.normal(kb, (Cout,), dtype=jnp.float32) * 0.1
    gamma = 1.0 + 0.1 * jax.random.normal(kg, (Cout,), dtype=jnp.float32)
    beta = 0.1 * jax.random.normal(kbt, (Cout,), dtype=jnp.float32)

    for stride in (1, 2):
        out = conv_layer_forward(x, weight, bias, gamma, beta,
                                 kernel_size=k, stride=stride)
        out = jax.block_until_ready(out)
        ref = _reference(x, weight, bias, gamma, beta, k, stride)
        assert out.shape == ref.shape, (stride, out.shape, ref.shape)
        # bf16 MXU operands + bf16 output -> relaxed tolerance vs. the f32 reference.
        err = float(jnp.max(jnp.abs(out.astype(jnp.float32) - ref)))
        assert jnp.allclose(out.astype(jnp.float32), ref, atol=4e-2, rtol=4e-2), (stride, err)

    print("KERNEL_OK")
</pallas_src>

<mosaic_0001>
module attributes {stable_mosaic.version = 11 : i64} {
  func.func @kernel(%arg0: i32, %arg1: i32, %arg2: memref<1x1x8x512xbf16, #tpu.memory_space<vmem>>, %arg3: memref<8x72xbf16, #tpu.memory_space<vmem>>, %arg4: memref<1x384xf32, #tpu.memory_space<vmem>>, %arg5: memref<8x1xf32, #tpu.memory_space<vmem>>, %arg6: memref<8x1xf32, #tpu.memory_space<vmem>>, %arg7: memref<1x8x384xbf16, #tpu.memory_space<vmem>>, %arg8: memref<72x384xbf16, #tpu.memory_space<vmem>>) attributes {dimension_semantics = [#tpu.dimension_semantics<parallel>, #tpu.dimension_semantics<parallel>], iteration_bounds = array<i64: 2, 1>, scalar_prefetch = 0 : i64, scratch_operands = 1 : i64, tpu.core_type = #tpu.core_type<tc>, window_params = [{transform_indices = @transform_0, window_bounds = array<i64: 1, 1, 8, 512>}, {transform_indices = @transform_1, window_bounds = array<i64: 8, 72>}, {pipeline_mode = #tpu.pipeline_mode<synchronous>, transform_indices = @transform_2, window_bounds = array<i64: 1, 384>}, {transform_indices = @transform_3, window_bounds = array<i64: 8, 1>}, {transform_indices = @transform_4, window_bounds = array<i64: 8, 1>}, {transform_indices = @transform_5, window_bounds = array<i64: 1, 8, 384>}]} {
    %c0 = arith.constant 0 : index
    %c0_0 = arith.constant 0 : index
    %c0_1 = arith.constant 0 : index
    %c0_2 = arith.constant 0 : index
    %0 = vector.load %arg2[%c0, %c0_0, %c0_1, %c0_2] : memref<1x1x8x512xbf16, #tpu.memory_space<vmem>>, vector<1x1x8x384xbf16>
    %1 = vector.shape_cast %0 : vector<1x1x8x384xbf16> to vector<8x384xbf16>
    %c0_3 = arith.constant 0 : index
    %c0_4 = arith.constant 0 : index
    %2 = vector.load %arg8[%c0_3, %c0_4] : memref<72x384xbf16, #tpu.memory_space<vmem>>, vector<8x384xbf16>
    tpu.vector_store %arg8[%c0_3, %c0_4], %1 {strides = array<i32>} : memref<72x384xbf16, #tpu.memory_space<vmem>>, vector<8x384xbf16>,
    %c0_5 = arith.constant 0 : index
    %c0_6 = arith.constant 0 : index
    %c0_7 = arith.constant 0 : index
    %c1 = arith.constant 1 : index
    %3 = vector.load %arg2[%c0_5, %c0_6, %c0_7, %c1] : memref<1x1x8x512xbf16, #tpu.memory_space<vmem>>, vector<1x1x8x384xbf16>
    %4 = vector.shape_cast %3 : vector<1x1x8x384xbf16> to vector<8x384xbf16>
    %c8 = arith.constant 8 : index
    %c0_8 = arith.constant 0 : index
    %5 = vector.load %arg8[%c8, %c0_8] : memref<72x384xbf16, #tpu.memory_space<vmem>>, vector<8x384xbf16>
    tpu.vector_store %arg8[%c8, %c0_8], %4 {strides = array<i32>} : memref<72x384xbf16, #tpu.memory_space<vmem>>, vector<8x384xbf16>,
    %c0_9 = arith.constant 0 : index
    %c0_10 = arith.constant 0 : index
    %c0_11 = arith.constant 0 : index
    %c2 = arith.constant 2 : index
    %6 = vector.load %arg2[%c0_9, %c0_10, %c0_11, %c2] : memref<1x1x8x512xbf16, #tpu.memory_space<vmem>>, vector<1x1x8x384xbf16>
    %7 = vector.shape_cast %6 : vector<1x1x8x384xbf16> to vector<8x384xbf16>
    %c16 = arith.constant 16 : index
    %c0_12 = arith.constant 0 : index
    %8 = vector.load %arg8[%c16, %c0_12] : memref<72x384xbf16, #tpu.memory_space<vmem>>, vector<8x384xbf16>
    tpu.vector_store %arg8[%c16, %c0_12], %7 {strides = array<i32>} : memref<72x384xbf16, #tpu.memory_space<vmem>>, vector<8x384xbf16>,
    %c0_13 = arith.constant 0 : index
    %c0_14 = arith.constant 0 : index
    %c0_15 = arith.constant 0 : index
    %c18 = arith.constant 18 : index
    %9 = vector.load %arg2[%c0_13, %c0_14, %c0_15, %c18] : memref<1x1x8x512xbf16, #tpu.memory_space<vmem>>, vector<1x1x8x384xbf16>
    %10 = vector.shape_cast %9 : vector<1x1x8x384xbf16> to vector<8x384xbf16>
    %c24 = arith.constant 24 : index
    %c0_16 = arith.constant 0 : index
    %11 = vector.load %arg8[%c24, %c0_16] : memref<72x384xbf16, #tpu.memory_space<vmem>>, vector<8x384xbf16>
    tpu.vector_store %arg8[%c24, %c0_16], %10 {strides = array<i32>} : memref<72x384xbf16, #tpu.memory_space<vmem>>, vector<8x384xbf16>,
    %c0_17 = arith.constant 0 : index
    %c0_18 = arith.constant 0 : index
    %c0_19 = arith.constant 0 : index
    %c19 = arith.constant 19 : index
    %12 = vector.load %arg2[%c0_17, %c0_18, %c0_19, %c19] : memref<1x1x8x512xbf16, #tpu.memory_space<vmem>>, vector<1x1x8x384xbf16>
    %13 = vector.shape_cast %12 : vector<1x1x8x384xbf16> to vector<8x384xbf16>
    %c32 = arith.constant 32 : index
    %c0_20 = arith.constant 0 : index
    %14 = vector.load %arg8[%c32, %c0_20] : memref<72x384xbf16, #tpu.memory_space<vmem>>, vector<8x384xbf16>
    tpu.vector_store %arg8[%c32, %c0_20], %13 {strides = array<i32>} : memref<72x384xbf16, #tpu.memory_space<vmem>>, vector<8x384xbf16>,
    %c0_21 = arith.constant 0 : index
    %c0_22 = arith.constant 0 : index
    %c0_23 = arith.constant 0 : index
    %c20 = arith.constant 20 : index
    %15 = vector.load %arg2[%c0_21, %c0_22, %c0_23, %c20] : memref<1x1x8x512xbf16, #tpu.memory_space<vmem>>, vector<1x1x8x384xbf16>
    %16 = vector.shape_cast %15 : vector<1x1x8x384xbf16> to vector<8x384xbf16>
    %c40 = arith.constant 40 : index
    %c0_24 = arith.constant 0 : index
    %17 = vector.load %arg8[%c40, %c0_24] : memref<72x384xbf16, #tpu.memory_space<vmem>>, vector<8x384xbf16>
    tpu.vector_store %arg8[%c40, %c0_24], %16 {strides = array<i32>} : memref<72x384xbf16, #tpu.memory_space<vmem>>, vector<8x384xbf16>,
    %c0_25 = arith.constant 0 : index
    %c0_26 = arith.constant 0 : index
    %c0_27 = arith.constant 0 : index
    %c36 = arith.constant 36 : index
    %18 = vector.load %arg2[%c0_25, %c0_26, %c0_27, %c36] : memref<1x1x8x512xbf16, #tpu.memory_space<vmem>>, vector<1x1x8x384xbf16>
    %19 = vector.shape_cast %18 : vector<1x1x8x384xbf16> to vector<8x384xbf16>
    %c48 = arith.constant 48 : index
    %c0_28 = arith.constant 0 : index
    %20 = vector.load %arg8[%c48, %c0_28] : memref<72x384xbf16, #tpu.memory_space<vmem>>, vector<8x384xbf16>
    tpu.vector_store %arg8[%c48, %c0_28], %19 {strides = array<i32>} : memref<72x384xbf16, #tpu.memory_space<vmem>>, vector<8x384xbf16>,
    %c0_29 = arith.constant 0 : index
    %c0_30 = arith.constant 0 : index
    %c0_31 = arith.constant 0 : index
    %c37 = arith.constant 37 : index
    %21 = vector.load %arg2[%c0_29, %c0_30, %c0_31, %c37] : memref<1x1x8x512xbf16, #tpu.memory_space<vmem>>, vector<1x1x8x384xbf16>
    %22 = vector.shape_cast %21 : vector<1x1x8x384xbf16> to vector<8x384xbf16>
    %c56 = arith.constant 56 : index
    %c0_32 = arith.constant 0 : index
    %23 = vector.load %arg8[%c56, %c0_32] : memref<72x384xbf16, #tpu.memory_space<vmem>>, vector<8x384xbf16>
    tpu.vector_store %arg8[%c56, %c0_32], %22 {strides = array<i32>} : memref<72x384xbf16, #tpu.memory_space<vmem>>, vector<8x384xbf16>,
    %c0_33 = arith.constant 0 : index
    %c0_34 = arith.constant 0 : index
    %c0_35 = arith.constant 0 : index
    %c38 = arith.constant 38 : index
    %24 = vector.load %arg2[%c0_33, %c0_34, %c0_35, %c38] : memref<1x1x8x512xbf16, #tpu.memory_space<vmem>>, vector<1x1x8x384xbf16>
    %25 = vector.shape_cast %24 : vector<1x1x8x384xbf16> to vector<8x384xbf16>
    %c64 = arith.constant 64 : index
    %c0_36 = arith.constant 0 : index
    %26 = vector.load %arg8[%c64, %c0_36] : memref<72x384xbf16, #tpu.memory_space<vmem>>, vector<8x384xbf16>
    tpu.vector_store %arg8[%c64, %c0_36], %25 {strides = array<i32>} : memref<72x384xbf16, #tpu.memory_space<vmem>>, vector<8x384xbf16>,
    %c0_37 = arith.constant 0 : index
    %c0_38 = arith.constant 0 : index
    %27 = vector.load %arg3[%c0_37, %c0_38] : memref<8x72xbf16, #tpu.memory_space<vmem>>, vector<8x72xbf16>
    %c0_39 = arith.constant 0 : index
    %c0_40 = arith.constant 0 : index
    %28 = vector.load %arg8[%c0_39, %c0_40] : memref<72x384xbf16, #tpu.memory_space<vmem>>, vector<72x384xbf16>
    %cst = arith.constant dense<0.000000e+00> : vector<8x384xf32>
    %29 = tpu.matmul %27, %28, %cst {dimension_numbers = #tpu.dot_dimension_numbers<[1], [0], [0], [1], [0, 0, 1, 1], [], []>} : vector<8x72xbf16>, vector<72x384xbf16>, vector<8x384xf32> -> vector<8x384xf32>
    %c0_41 = arith.constant 0 : index
    %c0_42 = arith.constant 0 : index
    %30 = vector.load %arg4[%c0_41, %c0_42] : memref<1x384xf32, #tpu.memory_space<vmem>>, vector<1x384xf32>
    %31 = vector.broadcast %30 : vector<1x384xf32> to vector<8x384xf32>
    %32 = arith.mulf %29, %31 : vector<8x384xf32>
    %cst_43 = arith.constant dense<0.000000e+00> : vector<8xf32>
    %33 = vector.multi_reduction <add>, %32, %cst_43 [1] : vector<8x384xf32> to vector<8xf32>
    %34 = vector.shape_cast %33 : vector<8xf32> to vector<8x1xf32>
    %cst_44 = arith.constant 3.906250e-03 : f32
    %35 = vector.broadcast %cst_44 : f32 to vector<8x1xf32>
    %36 = arith.mulf %34, %35 : vector<8x1xf32>
    %37 = vector.broadcast %36 : vector<8x1xf32> to vector<8x384xf32>
    %38 = arith.subf %29, %37 : vector<8x384xf32>
    %39 = vector.broadcast %30 : vector<1x384xf32> to vector<8x384xf32>
    %40 = arith.mulf %38, %39 : vector<8x384xf32>
    %41 = arith.mulf %40, %40 : vector<8x384xf32>
    %cst_45 = arith.constant dense<0.000000e+00> : vector<8xf32>
    %42 = vector.multi_reduction <add>, %41, %cst_45 [1] : vector<8x384xf32> to vector<8xf32>
    %43 = vector.shape_cast %42 : vector<8xf32> to vector<8x1xf32>
    %cst_46 = arith.constant 3.906250e-03 : f32
    %44 = vector.broadcast %cst_46 : f32 to vector<8x1xf32>
    %45 = arith.mulf %43, %44 : vector<8x1xf32>
    %c0_47 = arith.constant 0 : index
    %c0_48 = arith.constant 0 : index
    %46 = vector.load %arg5[%c0_47, %c0_48] : memref<8x1xf32, #tpu.memory_space<vmem>>, vector<8x1xf32>
    %cst_49 = arith.constant 9.99999974E-6 : f32
    %47 = vector.broadcast %cst_49 : f32 to vector<8x1xf32>
    %48 = arith.addf %45, %47 : vector<8x1xf32>
    %49 = math.rsqrt %48 : vector<8x1xf32>
    %50 = arith.mulf %46, %49 : vector<8x1xf32>
    %c0_50 = arith.constant 0 : index
    %c0_51 = arith.constant 0 : index
    %51 = vector.load %arg6[%c0_50, %c0_51] : memref<8x1xf32, #tpu.memory_space<vmem>>, vector<8x1xf32>
    %52 = arith.mulf %36, %50 : vector<8x1xf32>
    %53 = arith.subf %51, %52 : vector<8x1xf32>
    %54 = vector.broadcast %50 : vector<8x1xf32> to vector<8x384xf32>
    %55 = arith.mulf %29, %54 : vector<8x384xf32>
    %56 = vector.broadcast %53 : vector<8x1xf32> to vector<8x384xf32>
    %57 = arith.addf %55, %56 : vector<8x384xf32>
    %58 = arith.truncf %57 : vector<8x384xf32> to vector<8x384xbf16>
    %c0_52 = arith.constant 0 : index
    %c0_53 = arith.constant 0 : index
    %c0_54 = arith.constant 0 : index
    %59 = vector.load %arg7[%c0_52, %c0_53, %c0_54] : memref<1x8x384xbf16, #tpu.memory_space<vmem>>, vector<1x8x384xbf16>
    %60 = vector.shape_cast %59 : vector<1x8x384xbf16> to vector<8x384xbf16>
    %61 = vector.shape_cast %58 : vector<8x384xbf16> to vector<1x8x384xbf16>
    tpu.vector_store %arg7[%c0_52, %c0_53, %c0_54], %61 {strides = array<i32>} : memref<1x8x384xbf16, #tpu.memory_space<vmem>>, vector<1x8x384xbf16>,
    return
  }
  func.func @transform_0(%arg0: i32, %arg1: i32) -> (i32, i32, i32, i32) {
    %c0_i32 = arith.constant 0 : i32
    %c0_i32_0 = arith.constant 0 : i32
    %c0_i32_1 = arith.constant 0 : i32
    %c0_i32_2 = arith.constant 0 : i32
    return %arg0, %c0_i32, %c0_i32_0, %c0_i32_1 : i32, i32, i32, i32
  }
  func.func @transform_1(%arg0: i32, %arg1: i32) -> (i32, i32) {
    %c0_i32 = arith.constant 0 : i32
    %c0_i32_0 = arith.constant 0 : i32
    return %arg1, %c0_i32 : i32, i32
  }
  func.func @transform_2(%arg0: i32, %arg1: i32) -> (i32, i32) {
    %c0_i32 = arith.constant 0 : i32
    %c0_i32_0 = arith.constant 0 : i32
    %c0_i32_1 = arith.constant 0 : i32
    return %c0_i32, %c0_i32_0 : i32, i32
  }
  func.func @transform_3(%arg0: i32, %arg1: i32) -> (i32, i32) {
    %c0_i32 = arith.constant 0 : i32
    %c0_i32_0 = arith.constant 0 : i32
    return %arg1, %c0_i32 : i32, i32
  }
  func.func @transform_4(%arg0: i32, %arg1: i32) -> (i32, i32) {
    %c0_i32 = arith.constant 0 : i32
    %c0_i32_0 = arith.constant 0 : i32
    return %arg1, %c0_i32 : i32, i32
  }
  func.func @transform_5(%arg0: i32, %arg1: i32) -> (i32, i32, i32) {
    %c0_i32 = arith.constant 0 : i32
    %c0_i32_0 = arith.constant 0 : i32
    return %arg0, %arg1, %c0_i32 : i32, i32, i32
  }
}

</mosaic_0001>

<bundles_post_ra>
// kernel: conv_layer_forward.1
= control target key start
LH: loop header
LB: loop body
LE: loop exit
PB: predicated region body
PF: predicated region fallthrough
CT: control target
= control target key end

     0   :  { %s1006_s18 = smov 0   ;;  %s1008_s19 = smov 0   ;;  %s1084_s0 = inlined_call_operand.vmem [shape: bf16[2,1,8,512], index: 0, kind: input, shape index: {}]   ;;  %s1085_s1 = inlined_call_operand.vmem [shape: bf16[8,72], index: 1, kind: input, shape index: {}]   ;;  %s1086_s2 = inlined_call_operand.vmem [shape: f32[1,384], index: 2, kind: input, shape index: {}]   ;;  %s1087_s3 = inlined_call_operand.vmem [shape: f32[8,1], index: 3, kind: input, shape index: {}]   ;;  %s1088_s4 = inlined_call_operand.vmem [shape: f32[8,1], index: 4, kind: input, shape index: {}]   ;;  %s1089_s5 = inlined_call_operand.vmem [shape: bf16[2,8,384], index: 5, kind: output, shape index: {}]  }
   0x1   :  { %s1010_s20 = smov 0  }
   0x2 LB: > { %s27_s21 = sadd.s32 1, %s959_s19  ;;  %p847_p0 = scmp.ge.s32.totalorder %s963_s20, 1  ;;  %s963_s20 = sphi %s1010_s20, %s15_s20   ;;  %s959_s19 = sphi %s1008_s19, %s1091_s19   ;;  %s955_s18 = sphi %s1006_s18, %s1090_s18  }
   0x3   : > { %p29_p1 = scmp.ge.s32.totalorder %s27_s21, 2  ;;  %p228_p2 = scmp.lt.s32.totalorder %s963_s20, 3 }
   0x5   : > { %s1093_s21 = smov (%p29_p1, %s27_s21), 0  ;;  %p229_p3 = pnand %p847_p0, %p228_p2 }
   0x6   : > { %p272_p4 = scmp.lt.s32.totalorder (!%p229_p3), %s955_s18, 1  ;;  %s965_s26 = smov (!%p229_p3), 90  }
   0x7   : > { %232 = sbr.rel (%p229_p3) target bundleno = 811 (0x32b), region = 40  ;;  %s966_s27 = smov (!%p229_p3), 92  }
   0x8   : > { %s968_s28 = smov (!%p229_p3), 91   ;;  %s969_s29 = smov (!%p229_p3), 109  }
   0x9   : > { %s970_s30 = smov (!%p229_p3), 108   ;;  %s971_s6 = smov (!%p229_p3), 126  }
   0xa   : > { %s972_s7 = smov (!%p229_p3), 110   ;;  %s974_s8 = smov (!%p229_p3), 127  }
   0xc   : > { %s1095_s18 = smov (!%p272_p4, %s955_s18), 1  ;;  %v967_v2 = vmov 0.0   ;;  %v973_v4 = vmov 0   ;;  %vm975_vm0 = vmmov 0   ;;  %vm313_vm1 = vcmask 1043456  }
   0xd   : > { %s873_s22 = sshll.u32 %s1095_s18, 4  ;;  %882 = vmatprep.subr.bf16.mxu1 %v967_v2  ;;  %585 = vmatprep.mubr.bf16.mxu0 %v973_v4  ;;  %vm441_vm2 = vcmask 736256   ;;  %vm405_vm3 = vcmask 752640   ;;  %vm423_vm4 = vcmask 744448   ;;  %vm369_vm5 = vcmask 891904   ;;  %s896_s17 = smul.u32 12, %s1095_s18 }
   0xe   : > { %s276_s25 = scalar_lea.vmem %s1084_s0, %s873_s22  ;;  %932 = vset.pattern.permute.xlu0 %v973_v4  ;;  %933 = vset.pattern.permute.xlu1 %v973_v4  ;;  %vm387_vm6 = vcmask 883712   ;;  %vm333_vm7 = vcmask 1031168   ;;  %vm351_vm8 = vcmask 900096   ;;  %vm315_vm9 = vcmask 1039360  }
   0xf   : > { %v1030_v0 = vld [vmem:[%s276_s25] sm:$0xff]  ;;  %v431_v1 = vld [vmem:[%s276_s25 + $0x8] sm:$0xff]  ;;  %892 = vmatprep.mubr.msk.bf16.mxu1 %vm975_vm0, %v967_v2  ;;  %vm539_vm10 = vcmask 588800   ;;  %s297_s24 = scalar_lea.vmem %s1089_s5, %s896_s17 }
  0x10   : > { %434 = vrot.lane.b32.xlu0 %v1030_v0, %s965_s26  ;;  %398 = vrot.lane.b32.xlu1 %v1030_v0, %s966_s27  ;;  %v300_v3 = vld [vmem:[%s276_s25 + $0x8] sm:$0xf] }
  0x11   : > { %302 = vst [vmem:[#allocation2 + $0x8] sm:$0xf] %v300_v3 }
  0x14   : > { %436 = vrot.lane.b32.xlu0 %v431_v1, %s965_s26  ;;  %400 = vrot.lane.b32.xlu1 %v431_v1, %s966_s27 }
  0x18   : > { %416 = vrot.lane.b32.xlu0 %v1030_v0, %s968_s28  ;;  %418 = vrot.lane.b32.xlu1 %v431_v1, %s968_s28 }
  0x1c   : > { %364 = vrot.lane.b32.xlu1 %v431_v1, %s969_s29  ;;  %362 = vrot.lane.b32.xlu0 %v1030_v0, %s969_s29 }
  0x20   : > { %382 = vrot.lane.b32.xlu1 %v431_v1, %s970_s30  ;;  %380 = vrot.lane.b32.xlu0 %v1030_v0, %s970_s30 }
  0x24   : > { %328 = vrot.lane.b32.xlu1 %v431_v1, %s971_s6  ;;  %326 = vrot.lane.b32.xlu0 %v1030_v0, %s971_s6 }
  0x28   : > { %346 = vrot.lane.b32.xlu1 %v431_v1, %s972_s7  ;;  %344 = vrot.lane.b32.xlu0 %v1030_v0, %s972_s7 }
  0x2c   : > { %309 = vrot.lane.b32.xlu1 %v431_v1, %s974_s8  ;;  %307 = vrot.lane.b32.xlu0 %v1030_v0, %s974_s8 }
  0x82   : > { %v435_v5 = vpop.permute.xlu0 %434  ;;  %v399_v6 = vpop.permute.xlu1 %398 }
  0x83   : > { %v438_v9 = vrot.slane %v435_v5, 4  ;;  %v402_v10 = vrot.slane %v399_v6, 4 }
  0x86   : > { %v437_v7 = vpop.permute.xlu0 %436  ;;  %v401_v8 = vpop.permute.xlu1 %400 }
  0x87   : > { %v439_v11 = vrot.slane %v437_v7, 4  ;;  %v403_v12 = vrot.slane %v401_v8, 4 }
  0x89   : > { %v440_v13 = vsel %vm313_vm1, %v438_v9, %v439_v11  ;;  %v443_v14 = vsel %vm441_vm2, %v437_v7, %v439_v11  ;;  %v404_v15 = vsel %vm313_vm1, %v402_v10, %v403_v12  ;;  %v407_v16 = vsel %vm405_vm3, %v401_v8, %v403_v12 }
  0x8a   : > { %v442_v17 = vsel %vm441_vm2, %v435_v5, %v440_v13  ;;  %447 = vst [vmem:[#allocation2 + $0x68] sm:$0xf] %v443_v14  ;;  %v406_v18 = vsel %vm405_vm3, %v399_v6, %v404_v15  ;;  %411 = vst [vmem:[#allocation2 + $0x50] sm:$0xf] %v407_v16  ;;  %v417_v19 = vpop.permute.xlu0 %416  ;;  %v419_v20 = vpop.permute.xlu1 %418  ;;  %v448_v15 = vld [vmem:[%s1085_s1] sm:$0xf] }
  0x8b   : > { %v420_v21 = vrot.slane %v417_v19, 4  ;;  %v421_v22 = vrot.slane %v419_v20, 4  ;;  %v864_v23 = vcombine.high %v442_v17, %v442_v17  ;;  %v863_v24 = vcombine.low %v442_v17, %v442_v17 }
  0x8c   : > { %v636_v17 = vlaneseq }
  0x8d   : > { %v422_v25 = vsel %vm313_vm1, %v420_v21, %v421_v22  ;;  %v425_v26 = vsel %vm423_vm4, %v419_v20, %v421_v22  ;;  %866 = vmatprep.subr.msk.bf16.mxu0 %vm313_vm1, %v864_v23  ;;  %v545_v27 = vsel %vm313_vm1, %v863_v24, 0 }
  0x8e   : > { %v424_v28 = vsel %vm423_vm4, %v417_v19, %v422_v25  ;;  %429 = vst [vmem:[#allocation2 + $0x5c] sm:$0xf] %v425_v26  ;;  %v365_v29 = vpop.permute.xlu1 %364  ;;  %v363_v30 = vpop.permute.xlu0 %362  ;;  %560 = vmatpush1.bf16.msra.mxu0 %v545_v27 }
  0x8f   : > { %v367_v31 = vrot.slane %v365_v29, 4  ;;  %v366_v32 = vrot.slane %v363_v30, 4  ;;  %v861_v33 = vcombine.high %v406_v18, %v424_v28  ;;  %v860_v34 = vcombine.low %v406_v18, %v424_v28 }
  0x90   : > { %v637_v18 = vshrl.u32 %v636_v17, 7 }
  0x91   : > { %v371_v35 = vsel %vm369_vm5, %v365_v29, %v367_v31  ;;  %v368_v36 = vsel %vm313_vm1, %v366_v32, %v367_v31  ;;  %v934_v37 = vld [vmem:[#allocation2 + $0x68] ss:$0 sps:$4 sm:$0xff]   ;;  %561 = vmatprep.subr.bf16.mxu0 %v861_v33 }
  0x92   : > { %375 = vst [vmem:[#allocation2 + $0x38] sm:$0xf] %v371_v35  ;;  %v370_v38 = vsel %vm369_vm5, %v363_v30, %v368_v36  ;;  %v383_v39 = vpop.permute.xlu1 %382  ;;  %v381_v40 = vpop.permute.xlu0 %380  ;;  %562 = vmatpush1.bf16.msra.mxu0 %v860_v34  ;;  %v551_v43 = vsel %vm313_vm1, %v934_v37, 0  ;;  %v638_v19 = vsub.s32 0, %v637_v18  ;;  %v642_v20 = vsub.s32 1, %v637_v18 }
  0x93   : > { %v385_v41 = vrot.slane %v383_v39, 4  ;;  %v384_v42 = vrot.slane %v381_v40, 4  ;;  %883 = vmatpush3.bf16.msra.mxu1 %v551_v43  ;;  %v646_v22 = vsub.s32 2, %v637_v18 }
  0x94   : > { %884 = vmatprep.subr.bf16.mxu1 %v967_v2 }
  0x95   : > { %v389_v44 = vsel %vm387_vm6, %v383_v39, %v385_v41  ;;  %v386_v45 = vsel %vm313_vm1, %v384_v42, %v385_v41  ;;  %v935_v46 = vld [vmem:[#allocation2 + $0x50] ss:$12 sps:$4 sm:$0xff]  }
  0x96   : > { %393 = vst [vmem:[#allocation2 + $0x44] sm:$0xf] %v389_v44  ;;  %v388_v47 = vsel %vm387_vm6, %v381_v40, %v386_v45  ;;  %v329_v48 = vpop.permute.xlu1 %328  ;;  %v327_v49 = vpop.permute.xlu0 %326 }
  0x97   : > { %v331_v50 = vrot.slane %v329_v48, 4  ;;  %v330_v51 = vrot.slane %v327_v49, 4  ;;  %v858_v52 = vcombine.high %v370_v38, %v388_v47  ;;  %v857_v53 = vcombine.low %v370_v38, %v388_v47  ;;  %885 = vmatpush3.bf16.msra.mxu1 %v935_v46 }
  0x98   : > { %886 = vmatprep.subr.bf16.mxu1 %v967_v2 }
  0x99   : > { %v335_v54 = vsel %vm333_vm7, %v329_v48, %v331_v50  ;;  %v332_v55 = vsel %vm313_vm1, %v330_v51, %v331_v50  ;;  %563 = vmatprep.subr.bf16.mxu0 %v858_v52 }
  0x9a   : > { %339 = vst [vmem:[#allocation2 + $0x20] sm:$0xf] %v335_v54  ;;  %v334_v56 = vsel %vm333_vm7, %v327_v49, %v332_v55  ;;  %v347_v57 = vpop.permute.xlu1 %346  ;;  %v345_v58 = vpop.permute.xlu0 %344  ;;  %564 = vmatpush1.bf16.msra.mxu0 %v857_v53  ;;  %v673_v53 = vld [vmem:[%s1087_s3] sm:$0xff] }
  0x9b   : > { %v349_v59 = vrot.slane %v347_v57, 4  ;;  %v348_v60 = vrot.slane %v345_v58, 4 }
  0x9d   : > { %v353_v61 = vsel %vm351_vm8, %v347_v57, %v349_v59  ;;  %v350_v62 = vsel %vm313_vm1, %v348_v60, %v349_v59  ;;  %v936_v63 = vld [vmem:[#allocation2 + $0x38] ss:$12 sps:$4 sm:$0xff]  }
  0x9e   : > { %357 = vst [vmem:[#allocation2 + $0x2c] sm:$0xf] %v353_v61  ;;  %v352_v1 = vsel %vm351_vm8, %v345_v58, %v350_v62  ;;  %v310_v3 = vpop.permute.xlu1 %309  ;;  %v308_v4 = vpop.permute.xlu0 %307  ;;  %887 = vmatpush3.bf16.msra.mxu1 %v936_v63 }
  0x9f   : > { %v312_v5 = vrot.slane %v310_v3, 4  ;;  %v311_v6 = vrot.slane %v308_v4, 4  ;;  %v855_v7 = vcombine.high %v334_v56, %v352_v1  ;;  %v854_v8 = vcombine.low %v334_v56, %v352_v1  ;;  %888 = vmatprep.subr.bf16.mxu1 %v967_v2  ;;  %v677_v56 = vld [vmem:[%s1088_s4] sm:$0xff] }
  0xa1   : > { %v317_v9 = vsel %vm315_vm9, %v310_v3, %v312_v5  ;;  %v314_v10 = vsel %vm313_vm1, %v311_v6, %v312_v5  ;;  %565 = vmatprep.subr.bf16.mxu0 %v855_v7 }
  0xa2   : > { %321 = vst [vmem:[#allocation2 + $0x14] sm:$0xf] %v317_v9  ;;  %v316_v11 = vsel %vm315_vm9, %v308_v4, %v314_v10  ;;  %566 = vmatpush1.bf16.msra.mxu0 %v854_v8 }
  0xa3   : > { %v852_v12 = vcombine.high %v1030_v0, %v316_v11  ;;  %v851_v13 = vcombine.low %v1030_v0, %v316_v11  ;;  %v634_v0 = vld [vmem:[%s1086_s2] sm:$0x7] }
  0xa4   : > { %v639_v21 = vrot.slane %v634_v0, %v638_v19  ;;  %v643_v23 = vrot.slane %v634_v0, %v642_v20  ;;  %v647_v27 = vrot.slane %v634_v0, %v646_v22 }
  0xa5   : > { %v937_v14 = vld [vmem:[#allocation2 + $0x20] ss:$12 sps:$4 sm:$0xff]   ;;  %567 = vmatprep.subr.bf16.mxu0 %v852_v12 }
  0xa6   : > { %568 = vmatpush1.bf16.msra.mxu0 %v851_v13  ;;  %889 = vmatpush3.bf16.msra.mxu1 %v937_v14 }
  0xa7   : > { %890 = vmatprep.subr.bf16.mxu1 %v967_v2 }
  0xa9   : > { %v938_v16 = vld [vmem:[#allocation2 + $0x8] ss:$12 sps:$4 sm:$0xff]   ;;  %867 = vmatmul.mubr.msk.bf16.vlgmr.msra.gmra.mxu0 %vm539_vm10, %v448_v15 }
  0xaa   : > { %891 = vmatpush3.bf16.msra.mxu1 %v938_v16 }
  0xad   : > { %893 = vmatmul.mubr.msk.bf16.vlgmr.msra.gmra.mxu1 %vm539_vm10, %v448_v15 }
 0x169   : > { %v587_v24 = vpop.f32.mrf.mxu0 }
 0x16a   : > { %v651_v25 = vmul.f32 %v639_v21, %v587_v24 }
 0x16b   : > { %v589_v26 = vpop.f32.mrf.mxu0 }
 0x16c   : > { %v652_v2 = vmul.f32 %v643_v23, %v589_v26 }
 0x16d   : > { %v591_v28 = vpop.f32.mrf.mxu0  ;;  %v628_v29 = vpop.f32.mrf.mxu1 }
 0x16e   : > { %v654_v30 = vadd.f32 %v652_v2, %v651_v25  ;;  %v653_v32 = vmul.f32 %v647_v27, %v628_v29 }
 0x16f   : > { %v592_v31 = vpop.f32.mrf.mxu0  ;;  %v894_v33 = vpop.f32.mrf.mxu1 }
 0x170   : > { %v655_v34 = vadd.f32 %v654_v30, %v653_v32 }
 0x171   : > { %v631_v35 = vpop.f32.mrf.mxu1 }
 0x172   : > { %656 = vadd.xlane.f32.xlu0 %v655_v34 }
 0x173   : > { %v895_v36 = vpop.f32.mrf.mxu1 }
 0x1fb   : > { %v657_v37 = vpop.xlane.xlu0 %656 }
 0x1fc   : > { %v658_v38 = vmul.f32 0.00390625, %v657_v37 }
 0x1fe   : > { %v659_v39 = vsub.f32 %v587_v24, %v658_v38  ;;  %v660_v40 = vsub.f32 %v589_v26, %v658_v38  ;;  %v661_v41 = vsub.f32 %v628_v29, %v658_v38 }
 0x200   : > { %v662_v42 = vmul.f32 %v659_v39, %v639_v21  ;;  %v663_v43 = vmul.f32 %v660_v40, %v643_v23  ;;  %v664_v44 = vmul.f32 %v661_v41, %v647_v27 }
 0x202   : > { %v665_v45 = vmul.f32 %v662_v42, %v662_v42  ;;  %v666_v46 = vmul.f32 %v663_v43, %v663_v43  ;;  %v667_v47 = vmul.f32 %v664_v44, %v664_v44 }
 0x204   : > { %v668_v48 = vadd.f32 %v666_v46, %v665_v45 }
 0x206   : > { %v669_v49 = vadd.f32 %v668_v48, %v667_v47 }
 0x208   : > { %670 = vadd.xlane.f32.xlu1 %v669_v49 }
 0x291   : > { %v671_v50 = vpop.xlane.xlu1 %670 }
 0x292   : > { %v672_v51 = vmul.f32 0.00390625, %v671_v50 }
 0x294   : > { %v674_v52 = vadd.f32 1e-05, %v672_v51 }
 0x296   : > { %939 = vrsqrt.f32 %v674_v52 }
 0x2a3   : > { %v940_v54 = vpop.eup %939 }
 0x2a4   : > { %v676_v55 = vmul.f32 %v940_v54, %v673_v53 }
 0x2a6   : > { %682 = vperm.xlu0 %932, %v676_v55   ;;  %v678_v57 = vmul.f32 %v676_v55, %v658_v38 }
 0x2a8   : > { %v679_v58 = vsub.f32 %v677_v56, %v678_v57 }
 0x2aa   : > { %690 = vperm.xlu1 %933, %v679_v58  }
 0x321   : > { %v683_v59 = vpop.permute.xlu0 %682 }
 0x322   : > { %v685_v60 = vmul.f32 %v683_v59, %v587_v24  ;;  %v686_v61 = vmul.f32 %v683_v59, %v589_v26  ;;  %v687_v62 = vmul.f32 %v683_v59, %v628_v29 }
 0x325   : > { %v691_v63 = vpop.permute.xlu1 %690 }
 0x326   : > { %v693_v1 = vadd.f32 %v691_v63, %v685_v60  ;;  %v694_v3 = vadd.f32 %v691_v63, %v686_v61  ;;  %v695_v4 = vadd.f32 %v691_v63, %v687_v62 }
 0x328   : > { %v874_v5 = vpack.c.bf16 %v694_v3, %v693_v1  ;;  %v875_v6 = vpack.c.bf16 %v695_v4, %v695_v4 }
 0x32a   : > { %709 = vst [vmem:[%s297_s24] sm:$0xff] %v874_v5  ;;  %710 = vst [vmem:[%s297_s24 + $0x8] sm:$0xf] %v875_v6 }
 0x32b PF: > { %s15_s20 = sadd.s32 1, %s963_s20   ;;  %s1090_s18 = smov %s959_s19 }
 0x32c   : > { %p12_p5 = scmp.ge.s32.totalorder %s15_s20, 4   ;;  %s1091_s19 = smov %s1093_s21 }
 0x32e   :  { %14 = sbr.rel (!%p12_p5) target bundleno = 2 (0x2), region = 79 }

</bundles_post_ra>
